<compile_context>
chip_gen: v6e
topology: v6e:2x2x1
jax: 0.10.0
libtpu: 0.0.40
codegen_flags: <defaults>
</compile_context>

<pallas_src>
import functools

import jax
import jax.numpy as jnp
from jax.experimental import pallas as pl
from jax.experimental.pallas import tpu as pltpu

D_IN, D_H1, D_H2, D_H3, D_OUT = 20, 64, 128, 64, 20
D_H1_PAD = 128  # lane-dense fc1 output width (zero-padded, exact)


def _mlp_kernel(x_ref, w1_ref, b1_ref, w2_ref, b2_ref, w34_ref, b34_ref, o_ref):
    cdt = w1_ref.dtype  # MXU operand dtype (f32 or bf16); accumulation stays f32
    # fc1 + relu  (x cast in-kernel; VPU op hidden under DMA slack)
    h = jnp.dot(x_ref[...].astype(cdt), w1_ref[...],
                preferred_element_type=jnp.float32)
    h = jnp.maximum(h + b1_ref[...], 0.0)
    # fc2 + relu
    h = jnp.dot(h.astype(cdt), w2_ref[...], preferred_element_type=jnp.float32)
    h = jnp.maximum(h + b2_ref[...], 0.0)
    # fused fc3+fc4 (fc3 has no activation; fold done in wrapper) + sigmoid
    h = jnp.dot(h.astype(cdt), w34_ref[...], preferred_element_type=jnp.float32)
    o_ref[...] = jax.nn.sigmoid(h + b34_ref[...])


def _round_up(n, m):
    return ((n + m - 1) // m) * m


@functools.partial(jax.jit, static_argnames=("bm", "use_bf16"))
def generator_global_distribution(x, params, *, bm=1024, use_bf16=False):
    """x: (B, 20) float32. params: dict of transposed weights / biases."""
    B = x.shape[0]

    # ---- parameter preprocessing (outside the kernel, once per call) ---------
    # lane-dense hidden: pad fc1 out-lanes (and matching fc2 in-rows) to 128.
    w1 = jnp.pad(params["w1"], ((0, 0), (0, D_H1_PAD - D_H1)))   # (20, 128)
    b1 = jnp.pad(params["b1"], ((0, 0), (0, D_H1_PAD - D_H1)))   # (1, 128)
    w2 = jnp.pad(params["w2"], ((0, D_H1_PAD - D_H1), (0, 0)))   # (128, 128)
    b2 = params["b2"]                                            # (1, 128)
    # fold fc3 (no activation) into fc4:  h @ W3 @ W4 + (b3 @ W4 + b4)
    w34 = params["w3"] @ params["w4"]                            # (128, 20)
    b34 = params["b3"] @ params["w4"] + params["b4"]             # (1, 20)

    if use_bf16:
        # weights only; x stays f32 and is cast inside the kernel.
        w1c, w2c, w34c = (w.astype(jnp.bfloat16) for w in (w1, w2, w34))
    else:
        w1c, w2c, w34c = w1, w2, w34

    # ---- batch tiling: big tiles, even grid when >1, zero-padded ragged B ----
    sub = 16 if use_bf16 else 8                  # dtype-aware sublane multiple
    bm_req = max(sub, _round_up(bm, sub))
    bm_eff = min(bm_req, _round_up(B, sub))
    grid = pl.cdiv(B, bm_eff)
    if grid > 1 and grid % 2 == 1:
        # balance v7x's two TensorCores: prefer an even number of grid steps.
        bm_eff = max(sub, _round_up(pl.cdiv(B, grid + 1), sub))
        grid = pl.cdiv(B, bm_eff)
        if grid % 2 == 1:                        # rare rounding edge case
            grid += 1
    B_pad = grid * bm_eff

    x_in = x if B_pad == B else jnp.pad(x, ((0, B_pad - B), (0, 0)))

    full = lambda a: pl.BlockSpec(a.shape, lambda i: (0,) * a.ndim)

    out = pl.pallas_call(
        _mlp_kernel,
        out_shape=jax.ShapeDtypeStruct((B_pad, D_OUT), jnp.float32),
        grid=(grid,),
        in_specs=[
            pl.BlockSpec((bm_eff, D_IN), lambda i: (i, 0)),   # x tile (f32)
            full(w1c), full(b1),                              # fc1 (padded)
            full(w2c), full(b2),                              # fc2 (padded rows)
            full(w34c), full(b34),                            # fused fc3+fc4
        ],
        # narrow, unpadded output: full 20-wide last dim, no wrapper col slice.
        out_specs=pl.BlockSpec((bm_eff, D_OUT), lambda i: (i, 0)),
        compiler_params=pltpu.CompilerParams(
            dimension_semantics=("parallel",)),
    )(x_in, w1c, b1, w2c, b2, w34c, b34)

    return out if B_pad == B else out[:B]


def init_params(key):
    """Deterministic synthetic parameters (PyTorch Linear shapes, transposed)."""
    def linear(k, fan_in, fan_out):
        kw, kb = jax.random.split(k)
        bound = 1.0 / jnp.sqrt(fan_in)
        # PyTorch stores weight as (out, in); we keep the transposed (in, out).
        w = jax.random.uniform(kw, (fan_in, fan_out), jnp.float32, -bound, bound)
        b = jax.random.uniform(kb, (1, fan_out), jnp.float32, -bound, bound)
        return w, b

    k1, k2, k3, k4 = jax.random.split(key, 4)
    w1, b1 = linear(k1, D_IN, D_H1)
    w2, b2 = linear(k2, D_H1, D_H2)
    w3, b3 = linear(k3, D_H2, D_H3)
    w4, b4 = linear(k4, D_H3, D_OUT)
    return dict(w1=w1, b1=b1, w2=w2, b2=b2, w3=w3, b3=b3, w4=w4, b4=b4)


def reference(x, p):
    """Un-fused JAX reference matching the PyTorch forward."""
    h = jnp.maximum(x @ p["w1"] + p["b1"], 0.0)
    h = jnp.maximum(h @ p["w2"] + p["b2"], 0.0)
    h = h @ p["w3"] + p["b3"]
    h = h @ p["w4"] + p["b4"]
    return jax.nn.sigmoid(h)


if __name__ == "__main__":
    key = jax.random.PRNGKey(0)
    kx, kp = jax.random.split(key)
    params = init_params(kp)

    # small shape consistent with the module: batch=8, latent dim=20
    x = jax.random.normal(kx, (8, D_IN), jnp.float32)
    out = jax.block_until_ready(generator_global_distribution(x, params))
    ref = reference(x, params)
    assert out.shape == (8, D_OUT)
    assert jnp.allclose(out, ref, atol=1e-4, rtol=1e-4), "f32 mismatch vs reference"

    # ragged batch (exercises zero-padded rows + row-slice path)
    x2 = jax.random.normal(jax.random.PRNGKey(1), (20, D_IN), jnp.float32)
    out2 = jax.block_until_ready(generator_global_distribution(x2, params))
    ref2 = reference(x2, params)
    assert out2.shape == (20, D_OUT)
    assert jnp.allclose(out2, ref2, atol=1e-4, rtol=1e-4), "ragged-batch mismatch"

    # multi-step grid with odd->even adjustment (grid 3 -> 4) using a small tile
    x3 = jax.random.normal(jax.random.PRNGKey(2), (300, D_IN), jnp.float32)
    out3 = jax.block_until_ready(
        generator_global_distribution(x3, params, bm=128))
    ref3 = reference(x3, params)
    assert out3.shape == (300, D_OUT)
    assert jnp.allclose(out3, ref3, atol=1e-4, rtol=1e-4), "multi-tile mismatch"

    # bf16 MXU-operand fast path (f32 x on the wire, in-kernel cast, f32 accum)
    out_bf16 = jax.block_until_ready(
        generator_global_distribution(x, params, use_bf16=True))
    assert jnp.allclose(out_bf16, ref, atol=5e-2, rtol=5e-2), "bf16 mismatch"

    print("KERNEL_OK")
</pallas_src>

<mosaic_0001>
module attributes {stable_mosaic.version = 11 : i64} {
  func.func @_mlp_kernel(%arg0: i32, %arg1: memref<8x20xf32, #tpu.memory_space<vmem>>, %arg2: memref<20x128xf32, #tpu.memory_space<vmem>>, %arg3: memref<1x128xf32, #tpu.memory_space<vmem>>, %arg4: memref<128x128xf32, #tpu.memory_space<vmem>>, %arg5: memref<1x128xf32, #tpu.memory_space<vmem>>, %arg6: memref<128x20xf32, #tpu.memory_space<vmem>>, %arg7: memref<1x20xf32, #tpu.memory_space<vmem>>, %arg8: memref<8x20xf32, #tpu.memory_space<vmem>>) attributes {dimension_semantics = [#tpu.dimension_semantics<parallel>], iteration_bounds = array<i64: 1>, scalar_prefetch = 0 : i64, scratch_operands = 0 : i64, tpu.core_type = #tpu.core_type<tc>, window_params = [{transform_indices = @transform_0, window_bounds = array<i64: 8, 20>}, {pipeline_mode = #tpu.pipeline_mode<synchronous>, transform_indices = @transform_1, window_bounds = array<i64: 20, 128>}, {pipeline_mode = #tpu.pipeline_mode<synchronous>, transform_indices = @transform_2, window_bounds = array<i64: 1, 128>}, {pipeline_mode = #tpu.pipeline_mode<synchronous>, transform_indices = @transform_3, window_bounds = array<i64: 128, 128>}, {pipeline_mode = #tpu.pipeline_mode<synchronous>, transform_indices = @transform_4, window_bounds = array<i64: 1, 128>}, {pipeline_mode = #tpu.pipeline_mode<synchronous>, transform_indices = @transform_5, window_bounds = array<i64: 128, 20>}, {pipeline_mode = #tpu.pipeline_mode<synchronous>, transform_indices = @transform_6, window_bounds = array<i64: 1, 20>}, {transform_indices = @transform_7, window_bounds = array<i64: 8, 20>}]} {
    %c0 = arith.constant 0 : index
    %c0_0 = arith.constant 0 : index
    %0 = vector.load %arg1[%c0, %c0_0] : memref<8x20xf32, #tpu.memory_space<vmem>>, vector<8x20xf32>
    %c0_1 = arith.constant 0 : index
    %c0_2 = arith.constant 0 : index
    %1 = vector.load %arg2[%c0_1, %c0_2] : memref<20x128xf32, #tpu.memory_space<vmem>>, vector<20x128xf32>
    %cst = arith.constant dense<0.000000e+00> : vector<8x128xf32>
    %2 = tpu.matmul %0, %1, %cst {dimension_numbers = #tpu.dot_dimension_numbers<[1], [0], [0], [1], [0, 0, 1, 1], [], []>} : vector<8x20xf32>, vector<20x128xf32>, vector<8x128xf32> -> vector<8x128xf32>
    %c0_3 = arith.constant 0 : index
    %c0_4 = arith.constant 0 : index
    %3 = vector.load %arg3[%c0_3, %c0_4] : memref<1x128xf32, #tpu.memory_space<vmem>>, vector<1x128xf32>
    %4 = vector.broadcast %3 : vector<1x128xf32> to vector<8x128xf32>
    %5 = arith.addf %2, %4 : vector<8x128xf32>
    %cst_5 = arith.constant 0.000000e+00 : f32
    %6 = vector.broadcast %cst_5 : f32 to vector<8x128xf32>
    %7 = arith.maximumf %5, %6 : vector<8x128xf32>
    %c0_6 = arith.constant 0 : index
    %c0_7 = arith.constant 0 : index
    %8 = vector.load %arg4[%c0_6, %c0_7] : memref<128x128xf32, #tpu.memory_space<vmem>>, vector<128x128xf32>
    %cst_8 = arith.constant dense<0.000000e+00> : vector<8x128xf32>
    %9 = tpu.matmul %7, %8, %cst_8 {dimension_numbers = #tpu.dot_dimension_numbers<[1], [0], [0], [1], [0, 0, 1, 1], [], []>} : vector<8x128xf32>, vector<128x128xf32>, vector<8x128xf32> -> vector<8x128xf32>
    %c0_9 = arith.constant 0 : index
    %c0_10 = arith.constant 0 : index
    %10 = vector.load %arg5[%c0_9, %c0_10] : memref<1x128xf32, #tpu.memory_space<vmem>>, vector<1x128xf32>
    %11 = vector.broadcast %10 : vector<1x128xf32> to vector<8x128xf32>
    %12 = arith.addf %9, %11 : vector<8x128xf32>
    %cst_11 = arith.constant 0.000000e+00 : f32
    %13 = vector.broadcast %cst_11 : f32 to vector<8x128xf32>
    %14 = arith.maximumf %12, %13 : vector<8x128xf32>
    %c0_12 = arith.constant 0 : index
    %c0_13 = arith.constant 0 : index
    %15 = vector.load %arg6[%c0_12, %c0_13] : memref<128x20xf32, #tpu.memory_space<vmem>>, vector<128x20xf32>
    %cst_14 = arith.constant dense<0.000000e+00> : vector<8x20xf32>
    %16 = tpu.matmul %14, %15, %cst_14 {dimension_numbers = #tpu.dot_dimension_numbers<[1], [0], [0], [1], [0, 0, 1, 1], [], []>} : vector<8x128xf32>, vector<128x20xf32>, vector<8x20xf32> -> vector<8x20xf32>
    %c0_15 = arith.constant 0 : index
    %c0_16 = arith.constant 0 : index
    %17 = vector.load %arg7[%c0_15, %c0_16] : memref<1x20xf32, #tpu.memory_space<vmem>>, vector<1x20xf32>
    %18 = vector.broadcast %17 : vector<1x20xf32> to vector<8x20xf32>
    %19 = arith.addf %16, %18 : vector<8x20xf32>
    %20 = arith.negf %19 : vector<8x20xf32>
    %21 = math.exp %20 : vector<8x20xf32>
    %cst_17 = arith.constant 1.000000e+00 : f32
    %22 = vector.broadcast %cst_17 : f32 to vector<8x20xf32>
    %23 = arith.addf %22, %21 : vector<8x20xf32>
    %24 = arith.divf %22, %23 : vector<8x20xf32>
    %c0_18 = arith.constant 0 : index
    %c0_19 = arith.constant 0 : index
    %25 = vector.load %arg8[%c0_18, %c0_19] : memref<8x20xf32, #tpu.memory_space<vmem>>, vector<8x20xf32>
    tpu.vector_store %arg8[%c0_18, %c0_19], %24 {strides = array<i32>} : memref<8x20xf32, #tpu.memory_space<vmem>>, vector<8x20xf32>,
    return
  }
  func.func @transform_0(%arg0: i32) -> (i32, i32) {
    %c0_i32 = arith.constant 0 : i32
    %c0_i32_0 = arith.constant 0 : i32
    return %arg0, %c0_i32 : i32, i32
  }
  func.func @transform_1(%arg0: i32) -> (i32, i32) {
    %c0_i32 = arith.constant 0 : i32
    %c0_i32_0 = arith.constant 0 : i32
    %c0_i32_1 = arith.constant 0 : i32
    return %c0_i32, %c0_i32_0 : i32, i32
  }
  func.func @transform_2(%arg0: i32) -> (i32, i32) {
    %c0_i32 = arith.constant 0 : i32
    %c0_i32_0 = arith.constant 0 : i32
    %c0_i32_1 = arith.constant 0 : i32
    return %c0_i32, %c0_i32_0 : i32, i32
  }
  func.func @transform_3(%arg0: i32) -> (i32, i32) {
    %c0_i32 = arith.constant 0 : i32
    %c0_i32_0 = arith.constant 0 : i32
    %c0_i32_1 = arith.constant 0 : i32
    return %c0_i32, %c0_i32_0 : i32, i32
  }
  func.func @transform_4(%arg0: i32) -> (i32, i32) {
    %c0_i32 = arith.constant 0 : i32
    %c0_i32_0 = arith.constant 0 : i32
    %c0_i32_1 = arith.constant 0 : i32
    return %c0_i32, %c0_i32_0 : i32, i32
  }
  func.func @transform_5(%arg0: i32) -> (i32, i32) {
    %c0_i32 = arith.constant 0 : i32
    %c0_i32_0 = arith.constant 0 : i32
    %c0_i32_1 = arith.constant 0 : i32
    return %c0_i32, %c0_i32_0 : i32, i32
  }
  func.func @transform_6(%arg0: i32) -> (i32, i32) {
    %c0_i32 = arith.constant 0 : i32
    %c0_i32_0 = arith.constant 0 : i32
    %c0_i32_1 = arith.constant 0 : i32
    return %c0_i32, %c0_i32_0 : i32, i32
  }
  func.func @transform_7(%arg0: i32) -> (i32, i32) {
    %c0_i32 = arith.constant 0 : i32
    %c0_i32_0 = arith.constant 0 : i32
    return %arg0, %c0_i32 : i32, i32
  }
}

</mosaic_0001>

<bundles_post_ra>
// kernel: generator_global_distribution.1
= control target key start
LH: loop header
LB: loop body
LE: loop exit
PB: predicated region body
PF: predicated region fallthrough
CT: control target
= control target key end

     0   :  { %vm42_vm0 = vcmask 1043456   ;;  %v477_v1 = vmov 0.0   ;;  %vm478_vm1 = vmmov 0   ;;  %vm38_vm2 = vcmask 162816   ;;  %s683_s0 = inlined_call_operand.vmem [shape: f32[8,20], index: 0, kind: input, shape index: {}]   ;;  %s684_s1 = inlined_call_operand.vmem [shape: f32[20,128], index: 1, kind: input, shape index: {}]   ;;  %s685_s2 = inlined_call_operand.vmem [shape: f32[1,128], index: 2, kind: input, shape index: {}]   ;;  %s686_s3 = inlined_call_operand.vmem [shape: f32[128,128], index: 3, kind: input, shape index: {}]   ;;  %s687_s4 = inlined_call_operand.vmem [shape: f32[1,128], index: 4, kind: input, shape index: {}]   ;;  %s688_s5 = inlined_call_operand.vmem [shape: f32[128,20], index: 5, kind: input, shape index: {}]   ;;  %s689_s6 = inlined_call_operand.vmem [shape: f32[1,20], index: 6, kind: input, shape index: {}]   ;;  %s690_s7 = inlined_call_operand.hbm [shape: f32[8,20], index: 7, kind: output, shape index: {}]  }
   0x1   :  { %v30_v0 = vld [vmem:[%s684_s1 + $0x10] sm:$0xf]  ;;  %369 = vmatprep.subr.mxu0 %v477_v1  ;;  %v29_v2 = vld [vmem:[%s684_s1 + $0x8] sm:$0xff]  ;;  %378 = vmatprep.subr.mxu1 %v477_v1  ;;  %v132_v3 = vld [vmem:[%s686_s3 + $0x78] sm:$0xff] }
   0x2   :  { %370 = vmatpush3.msk.msra.mxu0 %vm42_vm0, %v30_v0  ;;  %375 = vmatprep.mubr.msk.f32.mxu0 %vm478_vm1, %v477_v1  ;;  %v131_v4 = vld [vmem:[%s686_s3 + $0x70] sm:$0xff]  ;;  %v28_v5 = vld [vmem:[%s684_s1] sm:$0xff]  ;;  %v130_v7 = vld [vmem:[%s686_s3 + $0x68] sm:$0xff] }
   0x3   :  { %371 = vmatprep.subr.mxu0 %v477_v1  ;;  %379 = vmatpush3.msra.mxu1 %v132_v3  ;;  %v27_v6 = vld [vmem:[%s683_s0] sm:$0xff] }
   0x4   :  { %372 = vmatpush3.msra.mxu0 %v29_v2  ;;  %380 = vmatprep.subr.mxu1 %v477_v1  ;;  %v129_v8 = vld [vmem:[%s686_s3 + $0x60] sm:$0xff] }
   0x5   :  { %373 = vmatprep.subr.mxu0 %v477_v1  ;;  %381 = vmatpush3.msra.mxu1 %v131_v4 }
   0x6   :  { %374 = vmatpush3.msra.mxu0 %v28_v5  ;;  %382 = vmatprep.subr.mxu1 %v477_v1 }
   0x7   :  { %12 = vsyncpa [#allocation3], 0  ;;  %376 = vmatmul.mubr.msk.f32.vlgmr.msra.gmra.mxu0 %vm38_vm2, %v27_v6  ;;  %383 = vmatpush3.msra.mxu1 %v130_v7  ;;  %v128_v9 = vld [vmem:[%s686_s3 + $0x58] sm:$0xff]  ;;  %v127_v10 = vld [vmem:[%s686_s3 + $0x50] sm:$0xff] }
   0x8   :  { %384 = vmatprep.subr.mxu1 %v477_v1  ;;  %410 = vmatprep.mubr.msk.f32.mxu1 %vm478_vm1, %v477_v1  ;;  %v126_v11 = vld [vmem:[%s686_s3 + $0x48] sm:$0xff]  ;;  %v125_v12 = vld [vmem:[%s686_s3 + $0x40] sm:$0xff]  ;;  %v124_v13 = vld [vmem:[%s686_s3 + $0x38] sm:$0xff] }
   0x9   :  { %385 = vmatpush3.msra.mxu1 %v129_v8  ;;  %413 = vmatprep.subr.mxu0 %v477_v1  ;;  %v123_v14 = vld [vmem:[%s686_s3 + $0x30] sm:$0xff]  ;;  %v122_v15 = vld [vmem:[%s686_s3 + $0x28] sm:$0xff]  ;;  %v121_v16 = vld [vmem:[%s686_s3 + $0x20] sm:$0xff] }
   0xa   :  { %386 = vmatprep.subr.mxu1 %v477_v1  ;;  %445 = vmatprep.mubr.msk.f32.mxu0 %vm478_vm1, %v477_v1  ;;  %v120_v17 = vld [vmem:[%s686_s3 + $0x18] sm:$0xff]  ;;  %v119_v18 = vld [vmem:[%s686_s3 + $0x10] sm:$0xff]  ;;  %v118_v19 = vld [vmem:[%s686_s3 + $0x8] sm:$0xff] }
   0xb   :  { %387 = vmatpush3.msra.mxu1 %v128_v9  ;;  %v117_v20 = vld [vmem:[%s686_s3] sm:$0xff]  ;;  %v226_v21 = vld [vmem:[%s688_s5 + $0x78] sm:$0xff]  ;;  %v225_v22 = vld [vmem:[%s688_s5 + $0x70] sm:$0xff] }
   0xc   :  { %388 = vmatprep.subr.mxu1 %v477_v1  ;;  %414 = vmatpush3.msra.mxu0 %v226_v21  ;;  %v224_v23 = vld [vmem:[%s688_s5 + $0x68] sm:$0xff]  ;;  %v223_v24 = vld [vmem:[%s688_s5 + $0x60] sm:$0xff]  ;;  %v222_v25 = vld [vmem:[%s688_s5 + $0x58] sm:$0xff] }
   0xd   :  { %389 = vmatpush3.msra.mxu1 %v127_v10  ;;  %415 = vmatprep.subr.mxu0 %v477_v1  ;;  %v221_v26 = vld [vmem:[%s688_s5 + $0x50] sm:$0xff]  ;;  %v220_v27 = vld [vmem:[%s688_s5 + $0x48] sm:$0xff]  ;;  %v219_v28 = vld [vmem:[%s688_s5 + $0x40] sm:$0xff] }
   0xe   :  { %390 = vmatprep.subr.mxu1 %v477_v1  ;;  %416 = vmatpush3.msra.mxu0 %v225_v22  ;;  %v218_v29 = vld [vmem:[%s688_s5 + $0x38] sm:$0xff]  ;;  %v217_v30 = vld [vmem:[%s688_s5 + $0x30] sm:$0xff]  ;;  %v216_v31 = vld [vmem:[%s688_s5 + $0x28] sm:$0xff] }
   0xf   :  { %391 = vmatpush3.msra.mxu1 %v126_v11  ;;  %417 = vmatprep.subr.mxu0 %v477_v1  ;;  %v215_v32 = vld [vmem:[%s688_s5 + $0x20] sm:$0xff]  ;;  %v214_v33 = vld [vmem:[%s688_s5 + $0x18] sm:$0xff]  ;;  %v213_v39 = vld [vmem:[%s688_s5 + $0x10] sm:$0xff] }
  0x10   :  { %392 = vmatprep.subr.mxu1 %v477_v1  ;;  %418 = vmatpush3.msra.mxu0 %v224_v23  ;;  %v325_v34 = vld [vmem:[%s685_s2] ss:$0 sm:$0xff]  ;;  %v212_v40 = vld [vmem:[%s688_s5 + $0x8] sm:$0xff] }
  0x11   :  { %393 = vmatpush3.msra.mxu1 %v125_v12  ;;  %419 = vmatprep.subr.mxu0 %v477_v1  ;;  %v211_v41 = vld [vmem:[%s688_s5] sm:$0xff]  ;;  %s479_s5 = smov [#allocation2]  }
  0x12   :  { %394 = vmatprep.subr.mxu1 %v477_v1  ;;  %420 = vmatpush3.msra.mxu0 %v223_v24  ;;  %v328_v42 = vld [vmem:[%s687_s4] ss:$0 sm:$0xff]  ;;  %s317_s24 = sshll.u32 %s479_s5, 4  ;;  %s318_s24 = int_to_ptr.vmem [resolvable:$true] %s317_s24 }
  0x13   :  { %395 = vmatpush3.msra.mxu1 %v124_v13  ;;  %421 = vmatprep.subr.mxu0 %v477_v1  ;;  %v329_v47 = vld [vmem:[%s689_s6] ss:$0 sm:$0xff]  ;;  %s455_s4 = scalar_lea.vmem %s318_s24, 128  ;;  %p460_p1 = scmp.lt.s32.totalorder %s318_s24, %s318_s24 }
  0x14   :  { %396 = vmatprep.subr.mxu1 %v477_v1  ;;  %422 = vmatpush3.msra.mxu0 %v222_v25  ;;  %p456_p0 = scmp.ne.s32.totalorder %s318_s24, %s455_s4  ;;  %p461_p2 = scmp.lt.s32.totalorder %s455_s4, %s455_s4 }
  0x15   :  { %397 = vmatpush3.msra.mxu1 %v123_v14  ;;  %423 = vmatprep.subr.mxu0 %v477_v1 }
  0x16   :  { %398 = vmatprep.subr.mxu1 %v477_v1  ;;  %424 = vmatpush3.msra.mxu0 %v221_v26  ;;  %p462_p3 = por %p461_p2, %p460_p1 }
  0x17   :  { %399 = vmatpush3.msra.mxu1 %v122_v15  ;;  %425 = vmatprep.subr.mxu0 %v477_v1 }
  0x18   :  { %400 = vmatprep.subr.mxu1 %v477_v1  ;;  %426 = vmatpush3.msra.mxu0 %v220_v27  ;;  %p463_p4 = pnand %p462_p3, %p456_p0 }
  0x19   :  { %401 = vmatpush3.msra.mxu1 %v121_v16  ;;  %427 = vmatprep.subr.mxu0 %v477_v1 }
  0x1a   :  { %402 = vmatprep.subr.mxu1 %v477_v1  ;;  %428 = vmatpush3.msra.mxu0 %v219_v28 }
  0x1b   :  { %403 = vmatpush3.msra.mxu1 %v120_v17  ;;  %429 = vmatprep.subr.mxu0 %v477_v1 }
  0x1c   :  { %404 = vmatprep.subr.mxu1 %v477_v1  ;;  %430 = vmatpush3.msra.mxu0 %v218_v29 }
  0x1d   :  { %405 = vmatpush3.msra.mxu1 %v119_v18  ;;  %431 = vmatprep.subr.mxu0 %v477_v1 }
  0x1e   :  { %406 = vmatprep.subr.mxu1 %v477_v1  ;;  %432 = vmatpush3.msra.mxu0 %v217_v30 }
  0x1f   :  { %407 = vmatpush3.msra.mxu1 %v118_v19  ;;  %433 = vmatprep.subr.mxu0 %v477_v1 }
  0x20   :  { %408 = vmatprep.subr.mxu1 %v477_v1  ;;  %434 = vmatpush3.msra.mxu0 %v216_v31 }
  0x21   :  { %409 = vmatpush3.msra.mxu1 %v117_v20  ;;  %435 = vmatprep.subr.mxu0 %v477_v1 }
  0x22   :  { %436 = vmatpush3.msra.mxu0 %v215_v32 }
  0x23   :  { %437 = vmatprep.subr.mxu0 %v477_v1 }
  0x24   :  { %438 = vmatpush3.msra.mxu0 %v214_v33 }
  0x25   :  { %439 = vmatprep.subr.mxu0 %v477_v1 }
  0x26   :  { %440 = vmatpush3.msra.mxu0 %v213_v39 }
  0x27   :  { %441 = vmatprep.subr.mxu0 %v477_v1 }
  0x28   :  { %442 = vmatpush3.msra.mxu0 %v212_v40 }
  0x29   :  { %443 = vmatprep.subr.mxu0 %v477_v1 }
  0x2a   :  { %444 = vmatpush3.msra.mxu0 %v211_v41 }
  0xc7   :  { %v112_v35 = vpop.f32.mrf.mxu0 }
  0xc8   :  { %v113_v36 = vadd.f32 %v325_v34, %v112_v35 }
  0xc9   :  { %v377_v37 = vpop.f32.mrf.mxu0 }
  0xca   :  { %v116_v38 = vmax.f32 %v113_v36, 0.0 }
  0xcc   :  { %411 = vmatmul.mubr.f32.vlgmr.msra.gmra.mxu1 %v116_v38 }
 0x18c   :  { %v206_v43 = vpop.f32.mrf.mxu1 }
 0x18d   :  { %v207_v44 = vadd.f32 %v328_v42, %v206_v43 }
 0x18e   :  { %v412_v45 = vpop.f32.mrf.mxu1 }
 0x18f   :  { %v210_v46 = vmax.f32 %v207_v44, 0.0 }
 0x191   :  { %446 = vmatmul.mubr.f32.vlgmr.msra.gmra.mxu0 %v210_v46 }
 0x251   :  { %v300_v48 = vpop.f32.mrf.mxu0 }
 0x252   :  { %v301_v49 = vadd.f32 %v329_v47, %v300_v48 }
 0x253   :  { %v447_v50 = vpop.f32.mrf.mxu0 }
 0x254   :  { %v330_v51 = vmul.f32 -1.442695, %v301_v49 }
 0x256   :  { %451 = vpow2.f32 %v330_v51 }
 0x263   :  { %v452_v52 = vpop.eup %451 }
 0x264   :  { %v307_v53 = vadd.f32 1.0, %v452_v52 }
 0x266   :  { %453 = vrcp.f32 %v307_v53 }
 0x273   :  { %v454_v54 = vpop.eup %453 }
 0x274   :  { %310 = vst.msk [vmem:[#allocation2] sm:$0xff] %vm38_vm2, %v454_v54 }
 0x275   :  { %466 = shalt.err (!%p463_p4)
}
 0x276   :  { %320 = dma.vmem_to_hbm [thread:$0]  %s318_s24, 128, %s690_s7, [#allocation3]  }
 0x277   :  { %475 = dma.done.wait [#allocation3], 128  }
 0x278   :  { %476 = vsyncadd [#allocation3], 4294967168 }
 0x279   :  { %324 = vsyncpa [#allocation3], 1 }

</bundles_post_ra>
